<compile_context>
chip_gen: v5e
topology: v5e:2x2
jax: 0.10.0
libtpu: 0.0.40
codegen_flags: <defaults>
</compile_context>

<pallas_src>
import functools
import math

import jax
import jax.numpy as jnp
from jax import lax
from jax.experimental import pallas as pl
from jax.experimental.pallas import tpu as pltpu


def _round_up(n, m):
    return ((n + m - 1) // m) * m


# ---------------------------------------------------------------------------
# Kernel
# ---------------------------------------------------------------------------
def qnetwork_kernel(x_ref, w1_ref, b1_ref, w2_ref, b2_ref, wo_ref, bo_ref,
                    out_ref, *, fuse_mean, batch, action_size):
    """One batch tile of the dueling-DQN forward.

    x_ref : [bt, S]  f32  (cast to bf16 on-chip, hidden under the MXU)
    w*    : bf16 fused weights; b*: f32 fused biases
    out   : [bt, OP] bf16 slab: cols [0:A] = adv + val (with the batch mean of
            adv[:,0] already subtracted when fuse_mean), col A = raw adv[:,0].
    """
    x = x_ref[...].astype(jnp.bfloat16)

    # Shared first layer + ReLU (f32 accumulation on the MXU).
    h1 = jnp.dot(x, w1_ref[...], preferred_element_type=jnp.float32) + b1_ref[...]
    h1 = jnp.maximum(h1, 0.0)

    # Fused advantage|value hidden layer (H2 padded to 256) + ReLU.
    h2 = jnp.dot(h1.astype(jnp.bfloat16), w2_ref[...],
                 preferred_element_type=jnp.float32) + b2_ref[...]
    h2 = jnp.maximum(h2, 0.0)

    # Fused output layer: cols [0:A] = adv + val, col A = adv[:, 0], rest 0.
    z = jnp.dot(h2.astype(jnp.bfloat16), wo_ref[...],
                preferred_element_type=jnp.float32) + bo_ref[...]

    if fuse_mean:
        # Single-tile grid: finish the dueling combine in-kernel.
        # Padded rows hold relu(b1)-propagated garbage -> mask them out of the
        # batch mean using the (static) true batch size.
        adv0 = z[:, action_size:action_size + 1]               # [bt, 1], raw adv0
        row = lax.broadcasted_iota(jnp.int32, adv0.shape, 0)   # [bt, 1]
        adv0 = jnp.where(row < batch, adv0, 0.0)
        mean = jnp.sum(adv0, axis=0, keepdims=True) * (1.0 / batch)  # [1, 1]
        z = z - mean

    out_ref[...] = z.astype(out_ref.dtype)


# ---------------------------------------------------------------------------
# Parameter init (matches PyTorch: xavier_uniform_ weights, default Linear bias)
# Stored as [in, out] so the kernel does x @ W + b.
# ---------------------------------------------------------------------------
def _xavier_uniform(key, fan_in, fan_out):
    bound = math.sqrt(6.0 / (fan_in + fan_out))
    return jax.random.uniform(key, (fan_in, fan_out), jnp.float32, -bound, bound)


def _bias_uniform(key, fan_in, fan_out):
    bound = 1.0 / math.sqrt(fan_in)
    return jax.random.uniform(key, (1, fan_out), jnp.float32, -bound, bound)


def init_qnetwork_params(key, state_size, action_size,
                         first_layer_size=128, advantage_layer_size=128,
                         value_layer_size=32):
    ks = jax.random.split(key, 10)
    return {
        "w1":  _xavier_uniform(ks[0], state_size, first_layer_size),
        "b1":  _bias_uniform(ks[1], state_size, first_layer_size),
        "w2a": _xavier_uniform(ks[2], first_layer_size, advantage_layer_size),
        "b2a": _bias_uniform(ks[3], first_layer_size, advantage_layer_size),
        "w2v": _xavier_uniform(ks[4], first_layer_size, value_layer_size),
        "b2v": _bias_uniform(ks[5], first_layer_size, value_layer_size),
        "woa": _xavier_uniform(ks[6], advantage_layer_size, action_size),
        "boa": _bias_uniform(ks[7], advantage_layer_size, action_size),
        "wov": _xavier_uniform(ks[8], value_layer_size, 1),
        "bov": _bias_uniform(ks[9], value_layer_size, 1),
    }


def fuse_qnetwork_params(p):
    """Fuse branch weights for 3 wide matmuls; cast weights to bf16.

    W2  -> [H1, 256]  : [w2a | w2v | 0]        (H2 padded 160 -> 256, MXU-native)
    Wo  -> [256, 128] : cols 0..A-1 = adv+val weights (dueling add fused),
                        col  A      = raw adv0 weights (for the batch mean).
    """
    H1 = p["w1"].shape[1]
    ha = p["w2a"].shape[1]           # advantage hidden width (128)
    hv = p["w2v"].shape[1]           # value hidden width (32)
    a = p["woa"].shape[1]            # action_size
    H2 = _round_up(ha + hv, 128)     # 160 -> 256
    OP = _round_up(a + 1, 128)       # lane-dense output width

    w2 = jnp.zeros((H1, H2), jnp.float32)
    w2 = w2.at[:, :ha].set(p["w2a"])
    w2 = w2.at[:, ha:ha + hv].set(p["w2v"])
    b2 = jnp.zeros((1, H2), jnp.float32)
    b2 = b2.at[:, :ha].set(p["b2a"])
    b2 = b2.at[:, ha:ha + hv].set(p["b2v"])

    wo = jnp.zeros((H2, OP), jnp.float32)
    wo = wo.at[:ha, :a].set(p["woa"])                                   # adv part
    wo = wo.at[ha:ha + hv, :a].set(jnp.broadcast_to(p["wov"], (hv, a)))  # + value
    wo = wo.at[:ha, a].set(p["woa"][:, 0])                              # raw adv0
    bo = jnp.zeros((1, OP), jnp.float32)
    bo = bo.at[:, :a].set(p["boa"] + p["bov"])
    bo = bo.at[:, a].set(p["boa"][0, 0])

    return {
        "w1": p["w1"].astype(jnp.bfloat16),
        "b1": p["b1"],                       # f32
        "w2": w2.astype(jnp.bfloat16),
        "b2": b2,                            # f32
        "wo": wo.astype(jnp.bfloat16),
        "bo": bo,                            # f32
    }


# ---------------------------------------------------------------------------
# Forward wrapper
# ---------------------------------------------------------------------------
def qnetwork_forward(state, fused, action_size, *, b_tile_max=4096):
    """state: [B, state_size] f32; fused: output of fuse_qnetwork_params."""
    B, S = state.shape
    H1 = fused["w1"].shape[1]
    H2 = fused["w2"].shape[1]
    OP = fused["wo"].shape[1]
    assert OP >= action_size + 1

    # ---- batch tiling: few, large tiles ------------------------------------
    n_tiles = int(pl.cdiv(B, b_tile_max))
    if B >= 2048:
        n_tiles = max(n_tiles, 2)        # v7x: let ("parallel",) use both TCs
    bt = _round_up(int(pl.cdiv(B, n_tiles)), 16)
    b_pad = bt * n_tiles

    x = state                            # f32; cast to bf16 inside the kernel
    if b_pad != B:
        x = jnp.pad(x, ((0, b_pad - B), (0, 0)))

    fuse_mean = (n_tiles == 1)
    kernel = functools.partial(qnetwork_kernel, fuse_mean=fuse_mean,
                               batch=B, action_size=action_size)

    # ---- right-sized VMEM budget (v7x has only 64 MiB physical VMEM) -------
    vmem_bytes = (2 * bt * S * 4                              # x tiles, f32, 2 bufs
                  + 2 * bt * OP * 2                           # out tiles, bf16, 2 bufs
                  + 2 * (S * H1 + H1 * H2 + H2 * OP) * 2      # bf16 weights
                  + 2 * (H1 + H2 + OP) * 4                    # f32 biases
                  + bt * (H1 + H2 + OP) * 4                   # f32 h1/h2/z scratch
                  + bt * (H1 + H2) * 2)                       # bf16 casts of h1/h2
    vmem_limit = int(min(max(2 * vmem_bytes, 8 << 20), 48 << 20))

    flops = 2 * b_pad * (S * H1 + H1 * H2 + H2 * OP)
    bytes_accessed = (b_pad * S * 4 + b_pad * OP * 2
                      + (S * H1 + H1 * H2 + H2 * OP) * 2 + (H1 + H2 + OP) * 4)

    slab = pl.pallas_call(
        kernel,
        out_shape=jax.ShapeDtypeStruct((b_pad, OP), jnp.bfloat16),
        grid_spec=pltpu.PrefetchScalarGridSpec(
            num_scalar_prefetch=0,
            grid=(n_tiles,),
            in_specs=[
                pl.BlockSpec((bt, S), lambda i: (i, 0)),    # x: tiled over batch
                pl.BlockSpec((S, H1), lambda i: (0, 0)),    # weights: VMEM-resident
                pl.BlockSpec((1, H1), lambda i: (0, 0)),
                pl.BlockSpec((H1, H2), lambda i: (0, 0)),
                pl.BlockSpec((1, H2), lambda i: (0, 0)),
                pl.BlockSpec((H2, OP), lambda i: (0, 0)),
                pl.BlockSpec((1, OP), lambda i: (0, 0)),
            ],
            out_specs=pl.BlockSpec((bt, OP), lambda i: (i, 0)),
        ),
        compiler_params=pltpu.CompilerParams(
            dimension_semantics=("parallel",),      # megacore-shardable on v7x
            vmem_limit_bytes=vmem_limit,
        ),
        cost_estimate=pl.CostEstimate(flops=flops, transcendentals=0,
                                      bytes_accessed=bytes_accessed),
    )(x, fused["w1"], fused["b1"], fused["w2"], fused["b2"],
      fused["wo"], fused["bo"])

    q = slab[:B, :action_size].astype(jnp.float32)
    if fuse_mean:
        return q                          # dueling combine fully done in-kernel
    # Multi-tile grid: the batch mean couples every tile -> finish with a tiny
    # scalar reduction over the raw adv0 column (valid rows only).
    adv0 = slab[:B, action_size].astype(jnp.float32)
    return q - jnp.mean(adv0)


# ---------------------------------------------------------------------------
# Pure-JAX f32 reference (un-fused), matching the PyTorch module exactly:
#   q = adv - adv.mean(0)[0] + val     (batch mean of the action-0 advantage)
# ---------------------------------------------------------------------------
def qnetwork_reference(state, p):
    h1 = jnp.maximum(state @ p["w1"] + p["b1"], 0.0)
    ha = jnp.maximum(h1 @ p["w2a"] + p["b2a"], 0.0)
    adv = ha @ p["woa"] + p["boa"]
    hv = jnp.maximum(h1 @ p["w2v"] + p["b2v"], 0.0)
    val = hv @ p["wov"] + p["bov"]
    return adv - adv.mean(0)[0] + val


if __name__ == "__main__":
    key = jax.random.PRNGKey(0)
    k_state, k_state2, k_params = jax.random.split(key, 3)

    state_size, action_size = 16, 4
    params = init_qnetwork_params(k_params, state_size, action_size)
    fused = fuse_qnetwork_params(params)

    # --- small batch: single-tile grid, dueling combine fully in-kernel -----
    batch = 8
    state = jax.random.normal(k_state, (batch, state_size), jnp.float32)
    out = jax.block_until_ready(qnetwork_forward(state, fused, action_size))
    ref = qnetwork_reference(state, params)
    assert out.shape == (batch, action_size)
    # bf16 matmuls / bf16 output vs pure-f32 reference -> loose tolerance.
    assert jnp.allclose(out, ref, atol=5e-2, rtol=5e-2), (
        "single-tile mismatch vs reference; max abs err = "
        f"{float(jnp.max(jnp.abs(out - ref)))}")

    # --- larger batch with a small tile cap: exercises the multi-tile path
    #     (batch padding + wrapper-side scalar mean reduction). --------------
    batch2 = 602
    state2 = jax.random.normal(k_state2, (batch2, state_size), jnp.float32)
    out2 = jax.block_until_ready(
        qnetwork_forward(state2, fused, action_size, b_tile_max=256))
    ref2 = qnetwork_reference(state2, params)
    assert out2.shape == (batch2, action_size)
    assert jnp.allclose(out2, ref2, atol=5e-2, rtol=5e-2), (
        "multi-tile mismatch vs reference; max abs err = "
        f"{float(jnp.max(jnp.abs(out2 - ref2)))}")

    print("KERNEL_OK")
</pallas_src>

<mosaic_0001>
module attributes {stable_mosaic.version = 11 : i64} {
  func.func @qnetwork_kernel(%arg0: i32, %arg1: memref<16x16xf32, #tpu.memory_space<vmem>>, %arg2: memref<16x128xbf16, #tpu.memory_space<vmem>>, %arg3: memref<1x128xf32, #tpu.memory_space<vmem>>, %arg4: memref<128x256xbf16, #tpu.memory_space<vmem>>, %arg5: memref<1x256xf32, #tpu.memory_space<vmem>>, %arg6: memref<256x128xbf16, #tpu.memory_space<vmem>>, %arg7: memref<1x128xf32, #tpu.memory_space<vmem>>, %arg8: memref<16x128xbf16, #tpu.memory_space<vmem>>) attributes {dimension_semantics = [#tpu.dimension_semantics<parallel>], iteration_bounds = array<i64: 1>, scalar_prefetch = 0 : i64, scratch_operands = 0 : i64, tpu.core_type = #tpu.core_type<tc>, window_params = [{transform_indices = @transform_0, window_bounds = array<i64: 16, 16>}, {pipeline_mode = #tpu.pipeline_mode<synchronous>, transform_indices = @transform_1, window_bounds = array<i64: 16, 128>}, {pipeline_mode = #tpu.pipeline_mode<synchronous>, transform_indices = @transform_2, window_bounds = array<i64: 1, 128>}, {pipeline_mode = #tpu.pipeline_mode<synchronous>, transform_indices = @transform_3, window_bounds = array<i64: 128, 256>}, {pipeline_mode = #tpu.pipeline_mode<synchronous>, transform_indices = @transform_4, window_bounds = array<i64: 1, 256>}, {pipeline_mode = #tpu.pipeline_mode<synchronous>, transform_indices = @transform_5, window_bounds = array<i64: 256, 128>}, {pipeline_mode = #tpu.pipeline_mode<synchronous>, transform_indices = @transform_6, window_bounds = array<i64: 1, 128>}, {transform_indices = @transform_7, window_bounds = array<i64: 16, 128>}]} {
    %c0 = arith.constant 0 : index
    %c0_0 = arith.constant 0 : index
    %0 = vector.load %arg1[%c0, %c0_0] : memref<16x16xf32, #tpu.memory_space<vmem>>, vector<16x16xf32>
    %1 = arith.truncf %0 : vector<16x16xf32> to vector<16x16xbf16>
    %c0_1 = arith.constant 0 : index
    %c0_2 = arith.constant 0 : index
    %2 = vector.load %arg2[%c0_1, %c0_2] : memref<16x128xbf16, #tpu.memory_space<vmem>>, vector<16x128xbf16>
    %cst = arith.constant dense<0.000000e+00> : vector<16x128xf32>
    %3 = tpu.matmul %1, %2, %cst {dimension_numbers = #tpu.dot_dimension_numbers<[1], [0], [0], [1], [0, 0, 1, 1], [], []>} : vector<16x16xbf16>, vector<16x128xbf16>, vector<16x128xf32> -> vector<16x128xf32>
    %c0_3 = arith.constant 0 : index
    %c0_4 = arith.constant 0 : index
    %4 = vector.load %arg3[%c0_3, %c0_4] : memref<1x128xf32, #tpu.memory_space<vmem>>, vector<1x128xf32>
    %5 = vector.broadcast %4 : vector<1x128xf32> to vector<16x128xf32>
    %6 = arith.addf %3, %5 : vector<16x128xf32>
    %cst_5 = arith.constant 0.000000e+00 : f32
    %7 = vector.broadcast %cst_5 : f32 to vector<16x128xf32>
    %8 = arith.maximumf %6, %7 : vector<16x128xf32>
    %9 = arith.truncf %8 : vector<16x128xf32> to vector<16x128xbf16>
    %c0_6 = arith.constant 0 : index
    %c0_7 = arith.constant 0 : index
    %10 = vector.load %arg4[%c0_6, %c0_7] : memref<128x256xbf16, #tpu.memory_space<vmem>>, vector<128x256xbf16>
    %cst_8 = arith.constant dense<0.000000e+00> : vector<16x256xf32>
    %11 = tpu.matmul %9, %10, %cst_8 {dimension_numbers = #tpu.dot_dimension_numbers<[1], [0], [0], [1], [0, 0, 1, 1], [], []>} : vector<16x128xbf16>, vector<128x256xbf16>, vector<16x256xf32> -> vector<16x256xf32>
    %c0_9 = arith.constant 0 : index
    %c0_10 = arith.constant 0 : index
    %12 = vector.load %arg5[%c0_9, %c0_10] : memref<1x256xf32, #tpu.memory_space<vmem>>, vector<1x256xf32>
    %13 = vector.broadcast %12 : vector<1x256xf32> to vector<16x256xf32>
    %14 = arith.addf %11, %13 : vector<16x256xf32>
    %cst_11 = arith.constant 0.000000e+00 : f32
    %15 = vector.broadcast %cst_11 : f32 to vector<16x256xf32>
    %16 = arith.maximumf %14, %15 : vector<16x256xf32>
    %17 = arith.truncf %16 : vector<16x256xf32> to vector<16x256xbf16>
    %c0_12 = arith.constant 0 : index
    %c0_13 = arith.constant 0 : index
    %18 = vector.load %arg6[%c0_12, %c0_13] : memref<256x128xbf16, #tpu.memory_space<vmem>>, vector<256x128xbf16>
    %cst_14 = arith.constant dense<0.000000e+00> : vector<16x128xf32>
    %19 = tpu.matmul %17, %18, %cst_14 {dimension_numbers = #tpu.dot_dimension_numbers<[1], [0], [0], [1], [0, 0, 1, 1], [], []>} : vector<16x256xbf16>, vector<256x128xbf16>, vector<16x128xf32> -> vector<16x128xf32>
    %c0_15 = arith.constant 0 : index
    %c0_16 = arith.constant 0 : index
    %20 = vector.load %arg7[%c0_15, %c0_16] : memref<1x128xf32, #tpu.memory_space<vmem>>, vector<1x128xf32>
    %21 = vector.broadcast %20 : vector<1x128xf32> to vector<16x128xf32>
    %22 = arith.addf %19, %21 : vector<16x128xf32>
    %23 = vector.extract_strided_slice %22 {offsets = [0, 4], sizes = [16, 1], strides = [1, 1]} : vector<16x128xf32> to vector<16x1xf32>
    %24 = tpu.iota {dimensions = array<i32: 0>} : vector<16x1xi32>
    %c8_i32 = arith.constant 8 : i32
    %25 = vector.broadcast %c8_i32 : i32 to vector<16x1xi32>
    %26 = arith.cmpi slt, %24, %25 : vector<16x1xi32>
    %cst_17 = arith.constant 0.000000e+00 : f32
    %27 = vector.broadcast %cst_17 : f32 to vector<16x1xf32>
    %28 = arith.select %26, %23, %27 : vector<16x1xi1>, vector<16x1xf32>
    %cst_18 = arith.constant dense<0.000000e+00> : vector<1xf32>
    %29 = vector.multi_reduction <add>, %28, %cst_18 [0] : vector<16x1xf32> to vector<1xf32>
    %30 = vector.shape_cast %29 : vector<1xf32> to vector<1x1xf32>
    %cst_19 = arith.constant 1.250000e-01 : f32
    %31 = vector.broadcast %cst_19 : f32 to vector<1x1xf32>
    %32 = arith.mulf %30, %31 : vector<1x1xf32>
    %33 = vector.broadcast %32 : vector<1x1xf32> to vector<16x128xf32>
    %34 = arith.subf %22, %33 : vector<16x128xf32>
    %35 = arith.truncf %34 : vector<16x128xf32> to vector<16x128xbf16>
    %c0_20 = arith.constant 0 : index
    %c0_21 = arith.constant 0 : index
    %36 = vector.load %arg8[%c0_20, %c0_21] : memref<16x128xbf16, #tpu.memory_space<vmem>>, vector<16x128xbf16>
    tpu.vector_store %arg8[%c0_20, %c0_21], %35 {strides = array<i32>} : memref<16x128xbf16, #tpu.memory_space<vmem>>, vector<16x128xbf16>,
    return
  }
  func.func @transform_0(%arg0: i32) -> (i32, i32) {
    %c0_i32 = arith.constant 0 : i32
    %c0_i32_0 = arith.constant 0 : i32
    return %arg0, %c0_i32 : i32, i32
  }
  func.func @transform_1(%arg0: i32) -> (i32, i32) {
    %c0_i32 = arith.constant 0 : i32
    %c0_i32_0 = arith.constant 0 : i32
    %c0_i32_1 = arith.constant 0 : i32
    return %c0_i32, %c0_i32_0 : i32, i32
  }
  func.func @transform_2(%arg0: i32) -> (i32, i32) {
    %c0_i32 = arith.constant 0 : i32
    %c0_i32_0 = arith.constant 0 : i32
    %c0_i32_1 = arith.constant 0 : i32
    return %c0_i32, %c0_i32_0 : i32, i32
  }
  func.func @transform_3(%arg0: i32) -> (i32, i32) {
    %c0_i32 = arith.constant 0 : i32
    %c0_i32_0 = arith.constant 0 : i32
    %c0_i32_1 = arith.constant 0 : i32
    return %c0_i32, %c0_i32_0 : i32, i32
  }
  func.func @transform_4(%arg0: i32) -> (i32, i32) {
    %c0_i32 = arith.constant 0 : i32
    %c0_i32_0 = arith.constant 0 : i32
    %c0_i32_1 = arith.constant 0 : i32
    return %c0_i32, %c0_i32_0 : i32, i32
  }
  func.func @transform_5(%arg0: i32) -> (i32, i32) {
    %c0_i32 = arith.constant 0 : i32
    %c0_i32_0 = arith.constant 0 : i32
    %c0_i32_1 = arith.constant 0 : i32
    return %c0_i32, %c0_i32_0 : i32, i32
  }
  func.func @transform_6(%arg0: i32) -> (i32, i32) {
    %c0_i32 = arith.constant 0 : i32
    %c0_i32_0 = arith.constant 0 : i32
    %c0_i32_1 = arith.constant 0 : i32
    return %c0_i32, %c0_i32_0 : i32, i32
  }
  func.func @transform_7(%arg0: i32) -> (i32, i32) {
    %c0_i32 = arith.constant 0 : i32
    %c0_i32_0 = arith.constant 0 : i32
    return %arg0, %c0_i32 : i32, i32
  }
}

</mosaic_0001>

<bundles_post_ra>
// kernel: tpu_custom_call.1
= control target key start
LH: loop header
LB: loop body
LE: loop exit
PB: predicated region body
PF: predicated region fallthrough
CT: control target
= control target key end

     0   :  { %12 = vsyncpa [#allocation3], 0  ;;  %s868_s0 = inlined_call_operand.hbm [shape: f32[16,16], index: 0, kind: input, shape index: {}]   ;;  %s869_s1 = inlined_call_operand.hbm [shape: bf16[16,128], index: 1, kind: input, shape index: {}]   ;;  %s870_s2 = inlined_call_operand.vmem [shape: f32[1,128], index: 2, kind: input, shape index: {}]   ;;  %s871_s3 = inlined_call_operand.hbm [shape: bf16[128,256], index: 3, kind: input, shape index: {}]   ;;  %s872_s4 = inlined_call_operand.vmem [shape: f32[1,256], index: 4, kind: input, shape index: {}]   ;;  %s873_s5 = inlined_call_operand.hbm [shape: bf16[256,128], index: 5, kind: input, shape index: {}]   ;;  %s874_s6 = inlined_call_operand.vmem [shape: f32[1,128], index: 6, kind: input, shape index: {}]   ;;  %s875_s7 = inlined_call_operand.hbm [shape: bf16[16,128], index: 7, kind: output, shape index: {}]  }
   0x1   :  { %13 = vsyncpa [#allocation6], 0 }
   0x2   :  { %14 = vsyncpa [#allocation9], 0  ;;  %s33_s26 = sshll.u32 %s869_s1, 4  ;;  %s34_s26 = int_to_ptr.hbm [resolvable:$true] %s33_s26 }
   0x3   :  { %15 = vsyncpa [#allocation4], 0  ;;  %s785_s27 = smov [#allocation5]   ;;  %s20_s8 = sshll.u32 %s868_s0, 4  ;;  %s21_s8 = int_to_ptr.hbm [resolvable:$true] %s20_s8 }
   0x4   :  { %s35_s28 = sshll.u32 %s785_s27, 4  ;;  %s786_s9 = smov 64   ;;  %s36_s28 = int_to_ptr.vmem [resolvable:$true] %s35_s28 }
   0x5   :  { %s787_s10 = smov 4   ;;  %s788_s11 = smov [#allocation2]  }
   0x6   :  { %41 = dma.hbm_to_vmem [thread:$0]  %s34_s26, 128, %s36_s28, [#allocation6], %s786_s9, %s786_s9, %s787_s10  }
   0x7   :  { %s22_s12 = sshll.u32 %s788_s11, 4  ;;  %s789_s1 = smov 128   ;;  %s23_s12 = int_to_ptr.vmem [resolvable:$true] %s22_s12 }
   0x8   :  { %s790_s13 = smov 8   ;;  %s48_s16 = sshll.u32 %s871_s3, 4  ;;  %s49_s16 = int_to_ptr.hbm [resolvable:$true] %s48_s16 }
   0x9   :  { %28 = dma.hbm_to_vmem [thread:$0]  %s21_s8, 256, %s23_s12, [#allocation3], %s789_s1, %s789_s1, %s790_s13  }
   0xa   :  { %s791_s17 = smov [#allocation7]   ;;  %s63_s20 = sshll.u32 %s873_s5, 4  ;;  %s64_s20 = int_to_ptr.hbm [resolvable:$true] %s63_s20 }
   0xb   :  { %s50_s0 = sshll.u32 %s791_s17, 4  ;;  %s792_s21 = smov [#allocation8]   ;;  %s51_s0 = int_to_ptr.vmem [resolvable:$true] %s50_s0 }
   0xc   :  { %56 = dma.hbm_to_vmem [thread:$0]  %s49_s16, 2048, %s51_s0, [#allocation6], %s789_s1, %s789_s1, %s790_s13  }
   0xd   :  { %s65_s22 = sshll.u32 %s792_s21, 4  ;;  %s66_s22 = int_to_ptr.vmem [resolvable:$true] %s65_s22 }
   0xe   :  { %71 = dma.hbm_to_vmem [thread:$0]  %s64_s20, 2048, %s66_s22, [#allocation9], %s786_s9, %s786_s9, %s787_s10  }
   0xf   :  { %777 = dma.done.wait [#allocation3], 256  }
  0x10   :  { %778 = vsyncadd [#allocation3], 4294967040 }
  0x11   :  { %779 = dma.done.wait [#allocation6], 2176  }
  0x12   :  { %780 = vsyncadd [#allocation6], 4294965120 }
  0x13   :  { %781 = dma.done.wait [#allocation9], 2048  }
  0x14   :  { %782 = vsyncadd [#allocation9], 4294965248  ;;  %v606_v0 = vld [vmem:[#allocation5] sm:$0xff]  ;;  %v91_v1 = vld [vmem:[#allocation2] sm:$0xff]  ;;  %vm106_vm0 = vcmask 130048   ;;  %vm430_vm1 = vcmask 39968  }
  0x15   :  { %v92_v2 = vld [vmem:[#allocation2 + $0x8] sm:$0xff]  ;;  %v622_v5 = vld [vmem:[#allocation7 + $0x74] sm:$0xf0]  ;;  %117 = vmatpush.bf16.msra.mxu0 %v606_v0  ;;  %v538_v8 = vld [vmem:[#allocation7 + $0x78] sm:$0xf0]  ;;  %s458_s28 = sshll.u32 %s875_s7, 4  ;;  %s459_s28 = int_to_ptr.hbm [resolvable:$true] %s458_s28 }
  0x16   :  { %v93_v3 = vpack.c.bf16 %v92_v2, %v91_v1  ;;  %v536_v4 = vld [vmem:[#allocation7 + $0x70] sm:$0xf]  ;;  %v621_v6 = vld [vmem:[#allocation7 + $0x74] sm:$0xf]  ;;  %v528_v9 = vld [vmem:[#allocation7 + $0x60] sm:$0xf] }
  0x17   :  { %v537_v7 = vor.u32 %v622_v5, %v536_v4  ;;  %v620_v10 = vld [vmem:[#allocation7 + $0x64] sm:$0xf0]  ;;  %v541_v11 = vor.u32 %v621_v6, %v538_v8  ;;  %v619_v12 = vld [vmem:[#allocation7 + $0x64] sm:$0xf]  ;;  %v530_v13 = vld [vmem:[#allocation7 + $0x68] sm:$0xf0] }
  0x18   :  { %v529_v14 = vor.u32 %v620_v10, %v528_v9  ;;  %477 = vmatmul.msk.bf16.vlgmr.msra.gmra.mxu0 %vm106_vm0, %v93_v3  ;;  %v533_v15 = vor.u32 %v619_v12, %v530_v13  ;;  %v520_v16 = vld [vmem:[#allocation7 + $0x50] sm:$0xf]  ;;  %v618_v17 = vld [vmem:[#allocation7 + $0x54] sm:$0xf0]  ;;  %v617_v18 = vld [vmem:[#allocation7 + $0x54] sm:$0xf] }
  0x19   :  { %229 = vmatpush.bf16.msra.mxu1 %v537_v7  ;;  %243 = vmatpush.bf16.msra.mxu2 %v541_v11  ;;  %v522_v19 = vld [vmem:[#allocation7 + $0x58] sm:$0xf0]  ;;  %v521_v20 = vor.u32 %v618_v17, %v520_v16  ;;  %v512_v22 = vld [vmem:[#allocation7 + $0x40] sm:$0xf]  ;;  %v616_v23 = vld [vmem:[#allocation7 + $0x44] sm:$0xf0] }
  0x1a   :  { %v525_v21 = vor.u32 %v617_v18, %v522_v19  ;;  %v615_v24 = vld [vmem:[#allocation7 + $0x44] sm:$0xf]  ;;  %v514_v25 = vld [vmem:[#allocation7 + $0x48] sm:$0xf0]  ;;  %v513_v26 = vor.u32 %v616_v23, %v512_v22  ;;  %v504_v28 = vld [vmem:[#allocation7 + $0x30] sm:$0xf] }
  0x1b   :  { %v517_v27 = vor.u32 %v615_v24, %v514_v25  ;;  %v614_v29 = vld [vmem:[#allocation7 + $0x34] sm:$0xf0]  ;;  %v613_v30 = vld [vmem:[#allocation7 + $0x34] sm:$0xf]  ;;  %v506_v32 = vld [vmem:[#allocation7 + $0x38] sm:$0xf0] }
  0x1c   :  { %v505_v31 = vor.u32 %v614_v29, %v504_v28  ;;  %v509_v33 = vor.u32 %v613_v30, %v506_v32  ;;  %v496_v34 = vld [vmem:[#allocation7 + $0x20] sm:$0xf]  ;;  %v612_v35 = vld [vmem:[#allocation7 + $0x24] sm:$0xf0]  ;;  %v611_v36 = vld [vmem:[#allocation7 + $0x24] sm:$0xf] }
  0x1d   :  { %230 = vmatpush.bf16.msra.mxu1 %v529_v14  ;;  %244 = vmatpush.bf16.msra.mxu2 %v533_v15  ;;  %v497_v37 = vor.u32 %v612_v35, %v496_v34  ;;  %v498_v38 = vld [vmem:[#allocation7 + $0x28] sm:$0xf0]  ;;  %v488_v40 = vld [vmem:[#allocation7 + $0x10] sm:$0xf]  ;;  %v610_v41 = vld [vmem:[#allocation7 + $0x14] sm:$0xf0] }
  0x1e   :  { %v501_v39 = vor.u32 %v611_v36, %v498_v38  ;;  %v609_v42 = vld [vmem:[#allocation7 + $0x14] sm:$0xf]  ;;  %v489_v43 = vor.u32 %v610_v41, %v488_v40  ;;  %v490_v44 = vld [vmem:[#allocation7 + $0x18] sm:$0xf0]  ;;  %v480_v46 = vld [vmem:[#allocation7] sm:$0xf] }
  0x1f   :  { %v493_v45 = vor.u32 %v609_v42, %v490_v44  ;;  %v608_v47 = vld [vmem:[#allocation7 + $0x4] sm:$0xf0]  ;;  %v607_v48 = vld [vmem:[#allocation7 + $0x4] sm:$0xf]  ;;  %v482_v50 = vld [vmem:[#allocation7 + $0x8] sm:$0xf0] }
  0x20   :  { %v481_v49 = vor.u32 %v608_v47, %v480_v46  ;;  %v485_v51 = vor.u32 %v607_v48, %v482_v50  ;;  %v630_v52 = vld [vmem:[#allocation8 + $0x38] sm:$0xff]  ;;  %v629_v54 = vld [vmem:[#allocation8 + $0x30] sm:$0xff]  ;;  %v628_v56 = vld [vmem:[#allocation8 + $0x28] sm:$0xff]  ;;  %v793_v29 = vmov 4  }
  0x21   :  { %231 = vmatpush.bf16.msra.mxu1 %v521_v20  ;;  %245 = vmatpush.bf16.msra.mxu2 %v525_v21  ;;  %v638_v53 = vld [vmem:[#allocation8 + $0x78] sm:$0xff]  ;;  %v637_v55 = vld [vmem:[#allocation8 + $0x70] sm:$0xff]  ;;  %v636_v57 = vld [vmem:[#allocation8 + $0x68] sm:$0xff] }
  0x22   :  { %395 = vmatpush.bf16.msra.mxu3 %v630_v52  ;;  %409 = vmatpush.bf16.msrb.mxu0 %v638_v53  ;;  %v627_v58 = vld [vmem:[#allocation8 + $0x20] sm:$0xff]  ;;  %v655_v60 = vld [vmem:[%s870_s2] ss:$0 sm:$0xff]  ;;  %v626_v3 = vld [vmem:[#allocation8 + $0x18] sm:$0xff] }
  0x23   :  { %v635_v4 = vld [vmem:[#allocation8 + $0x60] sm:$0xff]  ;;  %v625_v5 = vld [vmem:[#allocation8 + $0x10] sm:$0xff]  ;;  %v634_v6 = vld [vmem:[#allocation8 + $0x58] sm:$0xff]  ;;  %654 = vset.pattern.permute.xlu0 %v793_v29 }
  0x24   :  { %v624_v7 = vld [vmem:[#allocation8 + $0x8] sm:$0xff]  ;;  %v633_v8 = vld [vmem:[#allocation8 + $0x50] sm:$0xff]  ;;  %v623_v9 = vld [vmem:[#allocation8] sm:$0xff] }
  0x25   :  { %232 = vmatpush.bf16.msra.mxu1 %v513_v26  ;;  %246 = vmatpush.bf16.msra.mxu2 %v517_v27  ;;  %v632_v10 = vld [vmem:[#allocation8 + $0x48] sm:$0xff]  ;;  %v631_v11 = vld [vmem:[#allocation8 + $0x40] sm:$0xff] }
  0x26   :  { %396 = vmatpush.bf16.msra.mxu3 %v629_v54  ;;  %410 = vmatpush.bf16.msrb.mxu0 %v637_v55  ;;  %v143_v12 = vld [vmem:[%s872_s4] sm:$0x3] }
  0x27   :  { %v145_v14 = vperm.slane %v143_v12, 0  ;;  %v146_v18 = vperm.slane %v143_v12, 1  ;;  %v656_v30 = vld [vmem:[%s874_s6] ss:$0 sm:$0xff]  ;;  %s794_s6 = smov [#allocation10]  }
  0x28   :  { %s456_s25 = sshll.u32 %s794_s6, 4  ;;  %s457_s25 = int_to_ptr.vmem [resolvable:$true] %s456_s25 }
  0x29   :  { %233 = vmatpush.bf16.msra.mxu1 %v505_v31  ;;  %247 = vmatpush.bf16.msra.mxu2 %v509_v33 }
  0x2a   :  { %397 = vmatpush.bf16.msra.mxu3 %v628_v56  ;;  %411 = vmatpush.bf16.msrb.mxu0 %v636_v57 }
  0x2d   :  { %234 = vmatpush.bf16.msra.mxu1 %v497_v37  ;;  %248 = vmatpush.bf16.msra.mxu2 %v501_v39 }
  0x2e   :  { %398 = vmatpush.bf16.msra.mxu3 %v627_v58  ;;  %412 = vmatpush.bf16.msrb.mxu0 %v635_v4 }
  0x31   :  { %235 = vmatpush.bf16.msra.mxu1 %v489_v43  ;;  %249 = vmatpush.bf16.msra.mxu2 %v493_v45 }
  0x32   :  { %399 = vmatpush.bf16.msra.mxu3 %v626_v3  ;;  %413 = vmatpush.bf16.msrb.mxu0 %v634_v6 }
  0x35   :  { %236 = vmatpush.bf16.msra.mxu1 %v481_v49  ;;  %250 = vmatpush.bf16.msra.mxu2 %v485_v51 }
  0x36   :  { %400 = vmatpush.bf16.msra.mxu3 %v625_v5  ;;  %414 = vmatpush.bf16.msrb.mxu0 %v633_v8 }
  0x3a   :  { %401 = vmatpush.bf16.msra.mxu3 %v624_v7  ;;  %415 = vmatpush.bf16.msrb.mxu0 %v632_v10 }
  0x3e   :  { %402 = vmatpush.bf16.msra.mxu3 %v623_v9  ;;  %416 = vmatpush.bf16.msrb.mxu0 %v631_v11 }
  0x95   :  { %v119_v59 = vpop.f32.mrf.mxu0 }
  0x96   :  { %v120_v61 = vadd.f32 %v655_v60, %v119_v59 }
  0x98   :  { %v124_v0 = vmax.f32 %v120_v61, 0.0 }
  0x9d   :  { %v121_v62 = vpop.f32.mrf.mxu0 }
  0x9e   :  { %v122_v63 = vadd.f32 %v655_v60, %v121_v62 }
  0xa0   :  { %v125_v1 = vmax.f32 %v122_v63, 0.0 }
  0xa2   :  { %v126_v2 = vpack.c.bf16 %v125_v1, %v124_v0 }
  0xa4   :  { %237 = vmatmul.bf16.vlgmr.msra.gmra.mxu1 %v126_v2  ;;  %251 = vmatmul.bf16.vlgmr.msra.gmra.mxu2 %v126_v2 }
 0x121   :  { %v238_v13 = vpop.f32.mrf.mxu1 }
 0x122   :  { %v239_v16 = vadd.f32 %v238_v13, %v145_v14 }
 0x124   :  { %v257_v20 = vmax.f32 %v239_v16, 0.0 }
 0x127   :  { %v252_v15 = vpop.f32.mrf.mxu2 }
 0x128   :  { %v253_v22 = vadd.f32 %v252_v15, %v146_v18 }
 0x129   :  { %v240_v17 = vpop.f32.mrf.mxu1 }
 0x12a   :  { %v241_v19 = vadd.f32 %v240_v17, %v145_v14  ;;  %v258_v26 = vmax.f32 %v253_v22, 0.0 }
 0x12c   :  { %v259_v21 = vmax.f32 %v241_v19, 0.0 }
 0x12e   :  { %v261_v23 = vpack.c.bf16 %v259_v21, %v257_v20 }
 0x12f   :  { %v254_v24 = vpop.f32.mrf.mxu2 }
 0x130   :  { %v255_v25 = vadd.f32 %v254_v24, %v146_v18  ;;  %403 = vmatmul.bf16.vlgmr.msra.gmra.mxu3 %v261_v23 }
 0x132   :  { %v260_v27 = vmax.f32 %v255_v25, 0.0 }
 0x134   :  { %v262_v28 = vpack.c.bf16 %v260_v27, %v258_v26 }
 0x136   :  { %417 = vmatmul.bf16.vlgmr.msrb.gmra.mxu0 %v262_v28 }
 0x1b3   :  { %v404_v31 = vpop.f32.mrf.mxu3  ;;  %v418_v33 = vpop.f32.mrf.mxu0 }
 0x1b4   :  { %v405_v32 = vadd.f32 %v656_v30, %v404_v31 }
 0x1b6   :  { %v419_v34 = vadd.f32 %v418_v33, %v405_v32 }
 0x1b8   :  { %v431_v35 = vsel %vm430_vm1, %v419_v34, 0.0 }
 0x1b9   :  { %v434_v36 = vrot.slane %v431_v35, 4 }
 0x1bb   :  { %v435_v37 = vadd.f32 %v434_v36, %v431_v35  ;;  %v406_v43 = vpop.f32.mrf.mxu3  ;;  %v420_v45 = vpop.f32.mrf.mxu0 }
 0x1bc   :  { %v407_v44 = vadd.f32 %v656_v30, %v406_v43 }
 0x1bd   :  { %v436_v38 = vrot.slane %v435_v37, 2 }
 0x1be   :  { %v421_v46 = vadd.f32 %v420_v45, %v407_v44 }
 0x1bf   :  { %v437_v39 = vadd.f32 %v436_v38, %v435_v37 }
 0x1c1   :  { %v438_v40 = vrot.slane %v437_v39, 1 }
 0x1c3   :  { %v439_v41 = vadd.f32 %v438_v40, %v437_v39 }
 0x1c5   :  { %v440_v42 = vmul.f32 0.125, %v439_v41 }
 0x1c7   :  { %443 = vperm.xlu0 %654, %v440_v42  }
 0x239   :  { %v444_v47 = vpop.permute.xlu0 %443 }
 0x23a   :  { %v446_v48 = vsub.f32 %v419_v34, %v444_v47  ;;  %v447_v49 = vsub.f32 %v421_v46, %v444_v47 }
 0x23c   :  { %v642_v50 = vpack.c.bf16 %v447_v49, %v446_v48 }
 0x23e   :  { %643 = vst [vmem:[#allocation10] sm:$0xff] %v642_v50  }
 0x23f   :  { %464 = dma.vmem_to_hbm [thread:$0]  %s457_s25, 128, %s459_s28, [#allocation4], %s786_s9, %s786_s9, %s787_s10  }
 0x240   :  { %783 = dma.done.wait [#allocation4], 128  }
 0x241   :  { %784 = vsyncadd [#allocation4], 4294967168 }
 0x242   :  { %469 = vsyncpa [#allocation3], 1 }
 0x243   :  { %470 = vsyncpa [#allocation6], 1 }
 0x244   :  { %471 = vsyncpa [#allocation9], 1 }
 0x245   :  { %472 = vsyncpa [#allocation4], 1 }

</bundles_post_ra>
